<compile_context>
chip_gen: v6e
topology: v6e:2x2x1
jax: 0.10.0
libtpu: 0.0.40
codegen_flags: <defaults>
</compile_context>

<pallas_src>
import functools

import jax
import jax.numpy as jnp
from jax import lax
from jax.experimental import pallas as pl
from jax.experimental.pallas import tpu as pltpu

_LANE = 128
_ROW_MULTIPLE = 32                    # satisfies f32 (8,128), bf16 (16,128), int8 (32,128) tiling
_STEP_BYTE_BUDGET = 8 * 1024 * 1024   # combined (x + t) bytes per grid step (~16 MiB double-buffered)


def _accum(out_ref, p, t_raw, valid, targets_binary):
    """Adds this block's partial sums into the resident (3, 8, 128) accumulator.

    p            : (block_rows, 128) f32 sigmoid(x)
    t_raw        : (block_rows, 128) targets in native dtype
    valid        : optional (block_rows, 128) bool mask (tail block only)
    """
    if targets_binary:
        pred = t_raw != 0
        if valid is not None:
            pred = jnp.logical_and(pred, valid)
            p = jnp.where(valid, p, 0.0)
        pt = jnp.where(pred, p, 0.0)
        t = jnp.where(pred, 1.0, 0.0).astype(jnp.float32)
    else:
        t = t_raw.astype(jnp.float32)
        if valid is not None:
            p = jnp.where(valid, p, 0.0)
            t = jnp.where(valid, t, 0.0)
        pt = p * t

    # Fold (block_rows, 128) -> (block_rows//8, 8, 128): layout-preserving, so the
    # axis-0 sums are pure vreg adds (VPU) with no per-step cross-lane reduction.
    sub = p.shape[0] // 8
    out_ref[0] += jnp.sum(pt.reshape(sub, 8, _LANE), axis=0)
    out_ref[1] += jnp.sum(p.reshape(sub, 8, _LANE), axis=0)
    out_ref[2] += jnp.sum(t.reshape(sub, 8, _LANE), axis=0)


def _dice_kernel(x_ref, t_ref, out_ref, *, block_rows, num_blocks, tail_valid,
                 targets_binary, need_mask):
    i = pl.program_id(0)

    @pl.when(i == 0)
    def _():
        out_ref[...] = jnp.zeros_like(out_ref)

    xf = x_ref[...].astype(jnp.float32)
    # Single-transcendental sigmoid: one EUP tanh, no exp + exact divide.
    p = 0.5 * jnp.tanh(0.5 * xf) + 0.5
    t_raw = t_ref[...]

    if not need_mask:
        _accum(out_ref, p, t_raw, None, targets_binary)
    else:
        if num_blocks > 1:
            # Interior blocks are fully valid: no iota/compare/select work.
            @pl.when(i < num_blocks - 1)
            def _():
                _accum(out_ref, p, t_raw, None, targets_binary)

        @pl.when(i == num_blocks - 1)
        def _():
            # Block-local indices vs the tail block's valid count: no int32
            # overflow even for multi-GiB inputs, and one fewer wide multiply.
            row = lax.broadcasted_iota(jnp.int32, (block_rows, _LANE), 0)
            lane = lax.broadcasted_iota(jnp.int32, (block_rows, _LANE), 1)
            valid = row * _LANE + lane < tail_valid
            _accum(out_ref, p, t_raw, valid, targets_binary)


def dice_logits_loss(inputs, targets, smooth=1.0, reduction="sum"):
    """JAX/Pallas equivalent of hypertrack.losses.DiceLogitsLoss.forward."""
    if reduction == "sum":
        scale = 1.0
    elif reduction == "mean":
        scale = 1.0 / float(inputs.size)
    else:
        raise Exception("DiceLogitsLoss: Unknown reduction chosen")

    n = int(inputs.size)
    x = inputs.reshape(-1)
    t = targets.reshape(-1)
    targets_binary = t.dtype == jnp.bool_
    if targets_binary:
        t = t.astype(jnp.int8)   # 1 byte/elem; consumed as a predicate in-kernel

    # Only pad when the element count is not lane-aligned (< 128 extra elems);
    # validity of padded / overhang elements comes from in-kernel masking.
    n_pad = pl.cdiv(n, _LANE) * _LANE
    if n_pad != n:
        x = jnp.pad(x, (0, n_pad - n))
        t = jnp.pad(t, (0, n_pad - n))
    rows = n_pad // _LANE
    x2 = x.reshape(rows, _LANE)
    t2 = t.reshape(rows, _LANE)

    # Size blocks by byte width: ~8 MiB of combined (x + t) bytes per grid step,
    # ~16 MiB double-buffered -> safely under the 32 MiB scoped-VMEM limit on
    # every generation (v7x's 64 MiB per-TC VMEM included).
    row_bytes = _LANE * (x2.dtype.itemsize + t2.dtype.itemsize)
    row_cap = max(_ROW_MULTIPLE,
                  (_STEP_BYTE_BUDGET // row_bytes) // _ROW_MULTIPLE * _ROW_MULTIPLE)
    block_rows = min(row_cap, pl.cdiv(rows, _ROW_MULTIPLE) * _ROW_MULTIPLE)
    num_blocks = pl.cdiv(rows, block_rows)
    need_mask = num_blocks * block_rows * _LANE != n
    tail_valid = n - (num_blocks - 1) * block_rows * _LANE   # static Python int

    kernel = functools.partial(
        _dice_kernel,
        block_rows=block_rows,
        num_blocks=num_blocks,
        tail_valid=tail_valid,
        targets_binary=targets_binary,
        need_mask=need_mask,
    )

    partials = pl.pallas_call(
        kernel,
        out_shape=jax.ShapeDtypeStruct((3, 8, _LANE), jnp.float32),
        grid_spec=pltpu.PrefetchScalarGridSpec(
            num_scalar_prefetch=0,
            grid=(num_blocks,),
            in_specs=[
                pl.BlockSpec((block_rows, _LANE), lambda i: (i, 0)),
                pl.BlockSpec((block_rows, _LANE), lambda i: (i, 0)),
            ],
            out_specs=pl.BlockSpec((3, 8, _LANE), lambda i: (0, 0, 0)),
        ),
        compiler_params=pltpu.CompilerParams(
            dimension_semantics=("arbitrary",),
            vmem_limit_bytes=32 * 1024 * 1024,
        ),
    )(x2, t2)

    # Cross-lane/sublane reduction of the tiny (3, 8, 128) partials in XLA.
    sums = jnp.sum(partials, axis=(1, 2))  # [sum(p*t), sum(p), sum(t)]
    inter = sums[0] * scale
    denom = sums[1] * scale + sums[2] * scale + smooth
    dice = (2.0 * inter + smooth) / denom
    return 1.0 - dice


def _reference(inputs, targets, smooth=1.0, reduction="sum"):
    red = jnp.sum if reduction == "sum" else jnp.mean
    p = jax.nn.sigmoid(inputs.reshape(-1).astype(jnp.float32))
    t = targets.reshape(-1).astype(jnp.float32)
    inter = red(p * t)
    dice = (2.0 * inter + smooth) / (red(p) + red(t) + smooth)
    return 1.0 - dice


if __name__ == "__main__":
    key = jax.random.PRNGKey(0)
    k1, k2 = jax.random.split(key)
    # logits (e.g. segmentation head output, NCHW) and binary targets
    x = jax.random.normal(k1, (2, 4, 16, 16), dtype=jnp.float32)
    t_bool = jax.random.uniform(k2, (2, 4, 16, 16)) > 0.5
    t = t_bool.astype(jnp.float32)

    loss_sum = jax.block_until_ready(dice_logits_loss(x, t, smooth=1.0, reduction="sum"))
    loss_mean = jax.block_until_ready(dice_logits_loss(x, t, smooth=1.0, reduction="mean"))
    ref_sum = _reference(x, t, 1.0, "sum")
    ref_mean = _reference(x, t, 1.0, "mean")
    assert jnp.allclose(loss_sum, ref_sum, atol=1e-5, rtol=1e-5), (loss_sum, ref_sum)
    assert jnp.allclose(loss_mean, ref_mean, atol=1e-5, rtol=1e-5), (loss_mean, ref_mean)

    # Native-dtype path: bf16 logits + bool targets (predicate path, no upcast).
    loss_bool = jax.block_until_ready(
        dice_logits_loss(x.astype(jnp.bfloat16), t_bool, smooth=1.0, reduction="sum"))
    ref_bool = _reference(x.astype(jnp.bfloat16).astype(jnp.float32), t, 1.0, "sum")
    assert jnp.allclose(loss_bool, ref_bool, atol=1e-3, rtol=1e-3), (loss_bool, ref_bool)

    # int8 targets keep exact cast+multiply semantics.
    loss_i8 = jax.block_until_ready(
        dice_logits_loss(x, t.astype(jnp.int8), smooth=1.0, reduction="sum"))
    assert jnp.allclose(loss_i8, ref_sum, atol=1e-5, rtol=1e-5), (loss_i8, ref_sum)

    # Non-lane-aligned element count exercises the tail-mask path.
    x_odd = jax.random.normal(k1, (3, 5, 7, 11), dtype=jnp.float32)
    t_odd = (jax.random.uniform(k2, (3, 5, 7, 11)) > 0.5).astype(jnp.float32)
    loss_odd = jax.block_until_ready(dice_logits_loss(x_odd, t_odd, 1.0, "mean"))
    ref_odd = _reference(x_odd, t_odd, 1.0, "mean")
    assert jnp.allclose(loss_odd, ref_odd, atol=1e-5, rtol=1e-5), (loss_odd, ref_odd)

    print("KERNEL_OK")
</pallas_src>

<mosaic_0001>
module attributes {stable_mosaic.version = 11 : i64} {
  func.func @_dice_kernel(%arg0: i32, %arg1: memref<32x128xf32, #tpu.memory_space<vmem>>, %arg2: memref<32x128xf32, #tpu.memory_space<vmem>>, %arg3: memref<3x8x128xf32, #tpu.memory_space<vmem>>) attributes {dimension_semantics = [#tpu.dimension_semantics<arbitrary>], iteration_bounds = array<i64: 1>, scalar_prefetch = 0 : i64, scratch_operands = 0 : i64, tpu.core_type = #tpu.core_type<tc>, window_params = [{transform_indices = @transform_0, window_bounds = array<i64: 32, 128>}, {transform_indices = @transform_1, window_bounds = array<i64: 32, 128>}, {pipeline_mode = #tpu.pipeline_mode<synchronous>, transform_indices = @transform_2, window_bounds = array<i64: 3, 8, 128>}]} {
    %c0_i32 = arith.constant 0 : i32
    %0 = arith.cmpi eq, %arg0, %c0_i32 : i32
    %1 = arith.extui %0 : i1 to i32
    %c0_i32_0 = arith.constant 0 : i32
    %2 = arith.cmpi ne, %1, %c0_i32_0 : i32
    scf.if %2 {
      %cst_8 = arith.constant 0.000000e+00 : f32
      %15 = vector.broadcast %cst_8 : f32 to vector<3x8x128xf32>
      %c0_9 = arith.constant 0 : index
      %c0_10 = arith.constant 0 : index
      %c0_11 = arith.constant 0 : index
      %16 = vector.load %arg3[%c0_9, %c0_10, %c0_11] : memref<3x8x128xf32, #tpu.memory_space<vmem>>, vector<3x8x128xf32>
      tpu.vector_store %arg3[%c0_9, %c0_10, %c0_11], %15 {strides = array<i32>} : memref<3x8x128xf32, #tpu.memory_space<vmem>>, vector<3x8x128xf32>,
    } else {
    }
    %c0 = arith.constant 0 : index
    %c0_1 = arith.constant 0 : index
    %3 = vector.load %arg1[%c0, %c0_1] : memref<32x128xf32, #tpu.memory_space<vmem>>, vector<32x128xf32>
    %cst = arith.constant 5.000000e-01 : f32
    %4 = vector.broadcast %cst : f32 to vector<32x128xf32>
    %5 = arith.mulf %4, %3 : vector<32x128xf32>
    %6 = math.tanh %5 : vector<32x128xf32>
    %cst_2 = arith.constant 5.000000e-01 : f32
    %7 = vector.broadcast %cst_2 : f32 to vector<32x128xf32>
    %8 = arith.mulf %7, %6 : vector<32x128xf32>
    %cst_3 = arith.constant 5.000000e-01 : f32
    %9 = vector.broadcast %cst_3 : f32 to vector<32x128xf32>
    %10 = arith.addf %8, %9 : vector<32x128xf32>
    %c0_4 = arith.constant 0 : index
    %c0_5 = arith.constant 0 : index
    %11 = vector.load %arg2[%c0_4, %c0_5] : memref<32x128xf32, #tpu.memory_space<vmem>>, vector<32x128xf32>
    %c0_i32_6 = arith.constant 0 : i32
    %12 = arith.cmpi eq, %arg0, %c0_i32_6 : i32
    %13 = arith.extui %12 : i1 to i32
    %c0_i32_7 = arith.constant 0 : i32
    %14 = arith.cmpi ne, %13, %c0_i32_7 : i32
    scf.if %14 {
      %15 = tpu.iota {dimensions = array<i32: 0>} : vector<32x128xi32>
      %16 = tpu.iota {dimensions = array<i32: 1>} : vector<32x128xi32>
      %c128_i32 = arith.constant 128 : i32
      %17 = vector.broadcast %c128_i32 : i32 to vector<32x128xi32>
      %18 = arith.muli %15, %17 : vector<32x128xi32>
      %19 = arith.addi %18, %16 : vector<32x128xi32>
      %c2048_i32 = arith.constant 2048 : i32
      %20 = vector.broadcast %c2048_i32 : i32 to vector<32x128xi32>
      %21 = arith.cmpi slt, %19, %20 : vector<32x128xi32>
      %cst_8 = arith.constant 0.000000e+00 : f32
      %22 = vector.broadcast %cst_8 : f32 to vector<32x128xf32>
      %23 = arith.select %21, %10, %22 : vector<32x128xi1>, vector<32x128xf32>
      %cst_9 = arith.constant 0.000000e+00 : f32
      %24 = vector.broadcast %cst_9 : f32 to vector<32x128xf32>
      %25 = arith.select %21, %11, %24 : vector<32x128xi1>, vector<32x128xf32>
      %26 = arith.mulf %23, %25 : vector<32x128xf32>
      %c0_10 = arith.constant 0 : index
      %c0_11 = arith.constant 0 : index
      %c0_12 = arith.constant 0 : index
      %27 = vector.load %arg3[%c0_10, %c0_11, %c0_12] : memref<3x8x128xf32, #tpu.memory_space<vmem>>, vector<1x8x128xf32>
      %28 = vector.shape_cast %27 : vector<1x8x128xf32> to vector<8x128xf32>
      %29 = vector.shape_cast %26 : vector<32x128xf32> to vector<4x8x128xf32>
      %cst_13 = arith.constant dense<0.000000e+00> : vector<8x128xf32>
      %30 = vector.multi_reduction <add>, %29, %cst_13 [0] : vector<4x8x128xf32> to vector<8x128xf32>
      %31 = arith.addf %28, %30 : vector<8x128xf32>
      %c0_14 = arith.constant 0 : index
      %c0_15 = arith.constant 0 : index
      %c0_16 = arith.constant 0 : index
      %32 = vector.load %arg3[%c0_14, %c0_15, %c0_16] : memref<3x8x128xf32, #tpu.memory_space<vmem>>, vector<1x8x128xf32>
      %33 = vector.shape_cast %32 : vector<1x8x128xf32> to vector<8x128xf32>
      %34 = vector.shape_cast %31 : vector<8x128xf32> to vector<1x8x128xf32>
      tpu.vector_store %arg3[%c0_14, %c0_15, %c0_16], %34 {strides = array<i32>} : memref<3x8x128xf32, #tpu.memory_space<vmem>>, vector<1x8x128xf32>,
      %c1 = arith.constant 1 : index
      %c0_17 = arith.constant 0 : index
      %c0_18 = arith.constant 0 : index
      %35 = vector.load %arg3[%c1, %c0_17, %c0_18] : memref<3x8x128xf32, #tpu.memory_space<vmem>>, vector<1x8x128xf32>
      %36 = vector.shape_cast %35 : vector<1x8x128xf32> to vector<8x128xf32>
      %37 = vector.shape_cast %23 : vector<32x128xf32> to vector<4x8x128xf32>
      %cst_19 = arith.constant dense<0.000000e+00> : vector<8x128xf32>
      %38 = vector.multi_reduction <add>, %37, %cst_19 [0] : vector<4x8x128xf32> to vector<8x128xf32>
      %39 = arith.addf %36, %38 : vector<8x128xf32>
      %c1_20 = arith.constant 1 : index
      %c0_21 = arith.constant 0 : index
      %c0_22 = arith.constant 0 : index
      %40 = vector.load %arg3[%c1_20, %c0_21, %c0_22] : memref<3x8x128xf32, #tpu.memory_space<vmem>>, vector<1x8x128xf32>
      %41 = vector.shape_cast %40 : vector<1x8x128xf32> to vector<8x128xf32>
      %42 = vector.shape_cast %39 : vector<8x128xf32> to vector<1x8x128xf32>
      tpu.vector_store %arg3[%c1_20, %c0_21, %c0_22], %42 {strides = array<i32>} : memref<3x8x128xf32, #tpu.memory_space<vmem>>, vector<1x8x128xf32>,
      %c2 = arith.constant 2 : index
      %c0_23 = arith.constant 0 : index
      %c0_24 = arith.constant 0 : index
      %43 = vector.load %arg3[%c2, %c0_23, %c0_24] : memref<3x8x128xf32, #tpu.memory_space<vmem>>, vector<1x8x128xf32>
      %44 = vector.shape_cast %43 : vector<1x8x128xf32> to vector<8x128xf32>
      %45 = vector.shape_cast %25 : vector<32x128xf32> to vector<4x8x128xf32>
      %cst_25 = arith.constant dense<0.000000e+00> : vector<8x128xf32>
      %46 = vector.multi_reduction <add>, %45, %cst_25 [0] : vector<4x8x128xf32> to vector<8x128xf32>
      %47 = arith.addf %44, %46 : vector<8x128xf32>
      %c2_26 = arith.constant 2 : index
      %c0_27 = arith.constant 0 : index
      %c0_28 = arith.constant 0 : index
      %48 = vector.load %arg3[%c2_26, %c0_27, %c0_28] : memref<3x8x128xf32, #tpu.memory_space<vmem>>, vector<1x8x128xf32>
      %49 = vector.shape_cast %48 : vector<1x8x128xf32> to vector<8x128xf32>
      %50 = vector.shape_cast %47 : vector<8x128xf32> to vector<1x8x128xf32>
      tpu.vector_store %arg3[%c2_26, %c0_27, %c0_28], %50 {strides = array<i32>} : memref<3x8x128xf32, #tpu.memory_space<vmem>>, vector<1x8x128xf32>,
    } else {
    }
    return
  }
  func.func @transform_0(%arg0: i32) -> (i32, i32) {
    %c0_i32 = arith.constant 0 : i32
    %c0_i32_0 = arith.constant 0 : i32
    return %arg0, %c0_i32 : i32, i32
  }
  func.func @transform_1(%arg0: i32) -> (i32, i32) {
    %c0_i32 = arith.constant 0 : i32
    %c0_i32_0 = arith.constant 0 : i32
    return %arg0, %c0_i32 : i32, i32
  }
  func.func @transform_2(%arg0: i32) -> (i32, i32, i32) {
    %c0_i32 = arith.constant 0 : i32
    %c0_i32_0 = arith.constant 0 : i32
    %c0_i32_1 = arith.constant 0 : i32
    %c0_i32_2 = arith.constant 0 : i32
    return %c0_i32, %c0_i32_0, %c0_i32_1 : i32, i32, i32
  }
}

</mosaic_0001>

<bundles_post_ra>
// kernel: tpu_custom_call.1
= control target key start
LH: loop header
LB: loop body
LE: loop exit
PB: predicated region body
PF: predicated region fallthrough
CT: control target
= control target key end

     0   :  { %7 = vsyncpa [#allocation3], 0  ;;  %s269_s0 = inlined_call_operand.hbm [shape: f32[16,128], index: 0, kind: input, shape index: {}]   ;;  %s270_s1 = inlined_call_operand.hbm [shape: f32[16,128], index: 1, kind: input, shape index: {}]   ;;  %s271_s2 = inlined_call_operand.hbm [shape: f32[3,8,128], index: 2, kind: output, shape index: {}]  }
   0x1   :  { %8 = vsyncpa [#allocation6], 0 }
   0x2   :  { %9 = vsyncpa [#allocation4], 0 }
   0x3   :  { %14 = vsyncadd [#allocation3], 256  ;;  %s223_s9 = smov [#allocation2]  }
   0x4   :  { %s15_s10 = sshll.u32 %s223_s9, 4  ;;  %s16_s10 = int_to_ptr.vmem [resolvable:$true] %s15_s10 }
   0x5   :  { %s165_s11 = scalar_lea.vmem %s16_s10, 256  ;;  %s169_s12 = scalar_lea.vmem %s16_s10, 512 }
   0x6   :  { %p166_p0 = scmp.ne.s32.totalorder %s16_s10, %s165_s11  ;;  %p170_p1 = scmp.lt.s32.totalorder %s16_s10, %s16_s10 }
   0x7   :  { %p171_p2 = scmp.lt.s32.totalorder %s169_s12, %s165_s11 }
   0x9   :  { %p172_p3 = por %p171_p2, %p170_p1 }
   0xb   :  { %p173_p4 = pnand %p172_p3, %p166_p0 }
   0xd   :  { %176 = shalt.err (!%p173_p4)
}
   0xe   :  { %s224_s13 = smov 128   ;;  %s225_s14 = smov 8  }
   0xf   :  { %21 = dma.hbm_to_vmem [thread:$0]  %s269_s0, 256, %s16_s10, [#allocation3], %s224_s13, %s224_s13, %s225_s14  }
  0x10   :  { %26 = vsyncadd [#allocation6], 256  ;;  %s226_s17 = smov [#allocation5]  }
  0x11   :  { %s27_s18 = sshll.u32 %s226_s17, 4  ;;  %s28_s18 = int_to_ptr.vmem [resolvable:$true] %s27_s18 }
  0x12   :  { %s185_s19 = scalar_lea.vmem %s28_s18, 256  ;;  %s189_s20 = scalar_lea.vmem %s28_s18, 512 }
  0x13   :  { %p186_p5 = scmp.ne.s32.totalorder %s28_s18, %s185_s19  ;;  %p190_p6 = scmp.lt.s32.totalorder %s28_s18, %s28_s18 }
  0x14   :  { %p191_p7 = scmp.lt.s32.totalorder %s189_s20, %s185_s19 }
  0x16   :  { %p192_p8 = por %p191_p7, %p190_p6 }
  0x18   :  { %p193_p9 = pnand %p192_p8, %p186_p5 }
  0x1a   :  { %196 = shalt.err (!%p193_p9)
}
  0x1b   :  { %33 = dma.hbm_to_vmem [thread:$0]  %s270_s1, 256, %s28_s18, [#allocation6], %s224_s13, %s224_s13, %s225_s14  }
  0x1c   :  { %217 = dma.done.wait [#allocation3], 512  }
  0x1d   :  { %218 = vsyncadd [#allocation3], 4294966784 }
  0x1e   :  { %219 = dma.done.wait [#allocation6], 512  }
  0x1f   :  { %220 = vsyncadd [#allocation6], 4294966784  ;;  %v74_v0 = vlaneseq  ;;  %v47_v10 = vld [vmem:[#allocation2] sm:$0xff]  ;;  %v48_v11 = vld [vmem:[#allocation2 + $0x8] sm:$0xff]  ;;  %s227_s0 = smov [#allocation7]  }
  0x20   :  { %v49_v12 = vld [vmem:[#allocation2 + $0x10] sm:$0xff]  ;;  %v50_v14 = vld [vmem:[#allocation2 + $0x18] sm:$0xff]  ;;  %v51_v15 = vmul.f32 0.5, %v47_v10  ;;  %v52_v16 = vmul.f32 0.5, %v48_v11  ;;  %v67_v18 = vld [vmem:[#allocation5] sm:$0xff]  ;;  %s130_s1 = sshll.u32 %s227_s0, 4  ;;  %s131_s1 = int_to_ptr.vmem [resolvable:$true] %s130_s1 }
  0x21   :  { %v75_v1 = vshrl.u32 %v74_v0, 7  ;;  %v80_v2 = vand.u32 127, %v74_v0  ;;  %v53_v17 = vmul.f32 0.5, %v49_v12  ;;  %v68_v19 = vld [vmem:[#allocation5 + $0x8] sm:$0xff]  ;;  %v54_v21 = vmul.f32 0.5, %v50_v14  ;;  %v69_v24 = vld [vmem:[#allocation5 + $0x10] sm:$0xff]  ;;  %p202_p11 = scmp.lt.s32.totalorder %s131_s1, %s131_s1 }
  0x22   :  { %149 = vtanh.f32 %v51_v15  ;;  %v70_v27 = vld [vmem:[#allocation5 + $0x18] sm:$0xff]  ;;  %s197_s23 = scalar_lea.vmem %s131_s1, 384 }
  0x23   :  { %v76_v3 = vadd.s32 8, %v75_v1  ;;  %v77_v4 = vadd.s32 16, %v75_v1  ;;  %v78_v5 = vadd.s32 24, %v75_v1  ;;  %v81_v6 = vmul.u32 128, %v75_v1  ;;  %p198_p10 = scmp.ne.s32.totalorder %s131_s1, %s197_s23  ;;  %p203_p12 = scmp.lt.s32.totalorder %s197_s23, %s197_s23 }
  0x24   :  { %151 = vtanh.f32 %v52_v16 }
  0x25   :  { %v82_v7 = vmul.u32 128, %v76_v3  ;;  %v83_v8 = vmul.u32 128, %v77_v4  ;;  %v85_v9 = vadd.s32 %v81_v6, %v80_v2  ;;  %153 = vtanh.f32 %v53_v17  ;;  %p204_p13 = por %p203_p12, %p202_p11 }
  0x26   :  { %v84_v13 = vmul.u32 128, %v78_v5  ;;  %155 = vtanh.f32 %v54_v21 }
  0x27   :  { %v86_v20 = vadd.s32 %v82_v7, %v80_v2  ;;  %v87_v22 = vadd.s32 %v83_v8, %v80_v2  ;;  %vm89_vm0 = vcmp.lt.s32.totalorder %v85_v9, 2048  ;;  %p205_p0 = pnand %p204_p13, %p198_p10 }
  0x28   :  { %v88_v23 = vadd.s32 %v84_v13, %v80_v2  ;;  %v97_v25 = vsel %vm89_vm0, %v67_v18, 0.0 }
  0x29   :  { %vm90_vm1 = vcmp.lt.s32.totalorder %v86_v20, 2048  ;;  %vm91_vm2 = vcmp.lt.s32.totalorder %v87_v22, 2048 }
  0x2a   :  { %v98_v26 = vsel %vm90_vm1, %v68_v19, 0.0  ;;  %vm92_vm3 = vcmp.lt.s32.totalorder %v88_v23, 2048  ;;  %v99_v29 = vsel %vm91_vm2, %v69_v24, 0.0 }
  0x2b   :  { %v120_v28 = vadd.f32 %v98_v26, %v97_v25  ;;  %v100_v31 = vsel %vm92_vm3, %v70_v27, 0.0 }
  0x2d   :  { %v121_v30 = vadd.f32 %v120_v28, %v99_v29 }
  0x2f   :  { %v122_v32 = vadd.f32 %v121_v30, %v100_v31  ;;  %v150_v33 = vpop.eup %149 }
  0x30   :  { %v59_v35 = vmul.f32 0.5, %v150_v33 }
  0x31   :  { %124 = vst [vmem:[#allocation7 + $0x10] sm:$0xff] %v122_v32  ;;  %v152_v34 = vpop.eup %151 }
  0x32   :  { %v154_v36 = vpop.eup %153  ;;  %v60_v37 = vmul.f32 0.5, %v152_v34  ;;  %v63_v40 = vadd.f32 0.5, %v59_v35 }
  0x33   :  { %v156_v38 = vpop.eup %155  ;;  %v61_v39 = vmul.f32 0.5, %v154_v36 }
  0x34   :  { %v62_v41 = vmul.f32 0.5, %v156_v38  ;;  %v64_v42 = vadd.f32 0.5, %v60_v37  ;;  %v93_v44 = vsel %vm89_vm0, %v63_v40, 0.0 }
  0x35   :  { %v65_v43 = vadd.f32 0.5, %v61_v39  ;;  %v101_v47 = vmul.f32 %v97_v25, %v93_v44 }
  0x36   :  { %v66_v45 = vadd.f32 0.5, %v62_v41  ;;  %v94_v46 = vsel %vm90_vm1, %v64_v42, 0.0 }
  0x37   :  { %v95_v48 = vsel %vm91_vm2, %v65_v43, 0.0  ;;  %v102_v49 = vmul.f32 %v98_v26, %v94_v46  ;;  %v113_v50 = vadd.f32 %v94_v46, %v93_v44 }
  0x38   :  { %v96_v51 = vsel %vm92_vm3, %v66_v45, 0.0  ;;  %v103_v52 = vmul.f32 %v99_v29, %v95_v48 }
  0x39   :  { %v104_v53 = vmul.f32 %v100_v31, %v96_v51  ;;  %v106_v54 = vadd.f32 %v102_v49, %v101_v47  ;;  %v114_v55 = vadd.f32 %v113_v50, %v95_v48 }
  0x3b   :  { %v107_v56 = vadd.f32 %v106_v54, %v103_v52  ;;  %v115_v57 = vadd.f32 %v114_v55, %v96_v51 }
  0x3d   :  { %v108_v58 = vadd.f32 %v107_v56, %v104_v53  ;;  %117 = vst [vmem:[#allocation7 + $0x8] sm:$0xff] %v115_v57 }
  0x3f   :  { %110 = vst [vmem:[#allocation7] sm:$0xff] %v108_v58 }
  0x40   :  { %208 = shalt.err (!%p205_p0)
}
  0x41   :  { %136 = dma.vmem_to_hbm [thread:$0]  %s131_s1, 384, %s271_s2, [#allocation4], %s224_s13, %s224_s13, %s225_s14  }
  0x42   :  { %221 = dma.done.wait [#allocation4], 384  }
  0x43   :  { %222 = vsyncadd [#allocation4], 4294966912 }
  0x44   :  { %140 = vsyncpa [#allocation3], 1 }
  0x45   :  { %141 = vsyncpa [#allocation6], 1 }
  0x46   :  { %142 = vsyncpa [#allocation4], 1 }

</bundles_post_ra>
